<compile_context>
chip_gen: v7x
topology: tpu7x:2x2x1
jax: 0.10.0
libtpu: 0.0.40
codegen_flags: <defaults>
</compile_context>

<pallas_src>
import jax
import jax.numpy as jnp
from jax.experimental import pallas as pl
from jax.experimental.pallas import tpu as pltpu


def mlp_kernel(p_ref, x_ref, o_ref):
    # p_ref: SMEM, 11 scalars packed as [w1(3x2 row-major), b1(2), w2(2), b2(1)]
    # x_ref: VMEM block (3, TBS, 128)  -- features on the leading axis, batch on (sublane, lane)
    # o_ref: VMEM block (TBS, 128)
    w100 = p_ref[0]
    w101 = p_ref[1]
    w110 = p_ref[2]
    w111 = p_ref[3]
    w120 = p_ref[4]
    w121 = p_ref[5]
    b10 = p_ref[6]
    b11 = p_ref[7]
    w20 = p_ref[8]
    w21 = p_ref[9]
    b2 = p_ref[10]

    x0 = x_ref[0]  # (TBS, 128)
    x1 = x_ref[1]
    x2 = x_ref[2]

    # Hidden layer: Linear(3, 2) as VPU multiply-adds (dense (8,128) vregs).
    h0 = x0 * w100 + x1 * w110 + x2 * w120 + b10
    h1 = x0 * w101 + x1 * w111 + x2 * w121 + b11

    # SiLU: h * sigmoid(h); sigmoid(h) = 0.5 * (1 + tanh(h/2)) -> single EUP push, exact.
    s0 = h0 * (0.5 * (1.0 + jnp.tanh(0.5 * h0)))
    s1 = h1 * (0.5 * (1.0 + jnp.tanh(0.5 * h1)))

    # Dropout(p=0.2) -> identity (eval mode).
    # Output layer: Linear(2, 1).
    o_ref[...] = (s0 * w20 + s1 * w21 + b2).astype(o_ref.dtype)


def _round_up(n, m):
    return ((n + m - 1) // m) * m


def _choose_tbs(rows, max_rows_per_tile):
    """Pick the sublane-tile (rows of 128 lanes each), a multiple of 8."""
    rows = max(rows, 1)
    if rows < 16:
        return _round_up(rows, 8)
    if rows <= max_rows_per_tile:
        # Split into >= 2 roughly equal tiles so both TensorCores get work (v7x megacore).
        return _round_up((rows + 1) // 2, 8)
    return max_rows_per_tile


def pack_params(w1, b1, w2, b2):
    """w1: (3, 2) [in, out]; b1: (2,); w2: (2, 1); b2: (1,). -> (11,) f32 SMEM operand.

    NOTE: torch stores Linear weights as (out, in); transpose when porting a state dict.
    """
    return jnp.concatenate(
        [w1.reshape(-1), b1.reshape(-1), w2.reshape(-1), b2.reshape(-1)]
    ).astype(jnp.float32)


def neural_network_forward_feature_major(x_fm, w1, b1, w2, b2, *, max_rows_per_tile=2048):
    """x_fm: (3, B) feature-major float32 (avoids any wrapper-side transpose). Returns (B, 1)."""
    B = x_fm.shape[1]
    rows = pl.cdiv(B, 128)
    tbs = _choose_tbs(rows, max_rows_per_tile)
    rows_pad = _round_up(rows, tbs)
    b_pad = rows_pad * 128

    if b_pad != B:  # skip the pad entirely when the batch is already tile-aligned
        x_fm = jnp.pad(x_fm, ((0, 0), (0, b_pad - B)))
    x3 = x_fm.reshape(3, rows_pad, 128)  # free: row-major reshape

    params = pack_params(w1, b1, w2, b2)
    grid = (rows_pad // tbs,)

    out = pl.pallas_call(
        mlp_kernel,
        out_shape=jax.ShapeDtypeStruct((rows_pad, 128), x_fm.dtype),
        grid_spec=pltpu.PrefetchScalarGridSpec(
            num_scalar_prefetch=0,
            grid=grid,
            in_specs=[
                pl.BlockSpec(memory_space=pltpu.MemorySpace.SMEM),   # packed params (11,)
                pl.BlockSpec((3, tbs, 128), lambda i: (0, i, 0)),    # input slab tile
            ],
            out_specs=pl.BlockSpec((tbs, 128), lambda i: (i, 0)),    # lane-dense output tile
        ),
        compiler_params=pltpu.CompilerParams(
            dimension_semantics=("parallel",),
        ),
    )(params, x3)

    return out.reshape(-1)[:B].reshape(B, 1)


def neural_network_forward(x, w1, b1, w2, b2, *, max_rows_per_tile=2048, min_pallas_batch=4096):
    """x: (B, 3) float32. Returns (B, 1).

    For B below `min_pallas_batch` the plain jnp reference is used (fast path); pass
    min_pallas_batch=0 to force the Pallas kernel. For very large B, prefer the
    feature-major entry point to avoid the one-time transpose HBM pass.
    """
    B = x.shape[0]
    if B < min_pallas_batch:
        return reference_forward(x, w1, b1, w2, b2)
    return neural_network_forward_feature_major(
        x.T, w1, b1, w2, b2, max_rows_per_tile=max_rows_per_tile
    )


def init_params(key):
    k1, k2, k3, k4 = jax.random.split(key, 4)
    # (in, out) layout so the forward is x @ W (transposed from torch's (out, in)).
    w1 = jax.random.uniform(k1, (3, 2), jnp.float32, -0.5, 0.5)
    b1 = jax.random.uniform(k2, (2,), jnp.float32, -0.5, 0.5)
    w2 = jax.random.uniform(k3, (2, 1), jnp.float32, -0.5, 0.5)
    b2 = jax.random.uniform(k4, (1,), jnp.float32, -0.5, 0.5)
    return w1, b1, w2, b2


def reference_forward(x, w1, b1, w2, b2):
    h = x @ w1 + b1
    h = h * jax.nn.sigmoid(h)      # SiLU; Dropout(p=0.2) is identity in eval mode
    return h @ w2 + b2


if __name__ == "__main__":
    key = jax.random.PRNGKey(0)
    kx, kx2, kp = jax.random.split(key, 3)

    w1, b1, w2, b2 = init_params(kp)

    # Small batch: exercises the padded single-tile path (force the Pallas kernel).
    B = 8
    x = jax.random.normal(kx, (B, 3), jnp.float32)
    out = neural_network_forward(x, w1, b1, w2, b2, min_pallas_batch=0)
    out = jax.block_until_ready(out)
    ref = reference_forward(x, w1, b1, w2, b2)
    assert out.shape == (B, 1), out.shape
    assert jnp.allclose(out, ref, atol=1e-5, rtol=1e-5), (out, ref)

    # Aligned batch: exercises the no-pad, 2-tile (megacore-splittable) path.
    B2 = 2048
    x2 = jax.random.normal(kx2, (B2, 3), jnp.float32)
    out2 = neural_network_forward(x2, w1, b1, w2, b2, min_pallas_batch=0)
    out2 = jax.block_until_ready(out2)
    ref2 = reference_forward(x2, w1, b1, w2, b2)
    assert out2.shape == (B2, 1), out2.shape
    assert jnp.allclose(out2, ref2, atol=1e-5, rtol=1e-5)

    print("KERNEL_OK")
</pallas_src>

<mosaic_0001>
module attributes {stable_mosaic.version = 11 : i64} {
  func.func @mlp_kernel(%arg0: i32, %arg1: memref<11xf32, #tpu.memory_space<smem>>, %arg2: memref<3x8x128xf32, #tpu.memory_space<vmem>>, %arg3: memref<8x128xf32, #tpu.memory_space<vmem>>) attributes {dimension_semantics = [#tpu.dimension_semantics<parallel>], iteration_bounds = array<i64: 1>, scalar_prefetch = 0 : i64, scratch_operands = 0 : i64, tpu.core_type = #tpu.core_type<tc>, window_params = [{transform_indices = @transform_0, window_bounds = array<i64: 11>}, {transform_indices = @transform_1, window_bounds = array<i64: 3, 8, 128>}, {transform_indices = @transform_2, window_bounds = array<i64: 8, 128>}]} {
    %c0 = arith.constant 0 : index
    %0 = memref.load %arg1[%c0] : memref<11xf32, #tpu.memory_space<smem>>
    %c1 = arith.constant 1 : index
    %1 = memref.load %arg1[%c1] : memref<11xf32, #tpu.memory_space<smem>>
    %c2 = arith.constant 2 : index
    %2 = memref.load %arg1[%c2] : memref<11xf32, #tpu.memory_space<smem>>
    %c3 = arith.constant 3 : index
    %3 = memref.load %arg1[%c3] : memref<11xf32, #tpu.memory_space<smem>>
    %c4 = arith.constant 4 : index
    %4 = memref.load %arg1[%c4] : memref<11xf32, #tpu.memory_space<smem>>
    %c5 = arith.constant 5 : index
    %5 = memref.load %arg1[%c5] : memref<11xf32, #tpu.memory_space<smem>>
    %c6 = arith.constant 6 : index
    %6 = memref.load %arg1[%c6] : memref<11xf32, #tpu.memory_space<smem>>
    %c7 = arith.constant 7 : index
    %7 = memref.load %arg1[%c7] : memref<11xf32, #tpu.memory_space<smem>>
    %c8 = arith.constant 8 : index
    %8 = memref.load %arg1[%c8] : memref<11xf32, #tpu.memory_space<smem>>
    %c9 = arith.constant 9 : index
    %9 = memref.load %arg1[%c9] : memref<11xf32, #tpu.memory_space<smem>>
    %c10 = arith.constant 10 : index
    %10 = memref.load %arg1[%c10] : memref<11xf32, #tpu.memory_space<smem>>
    %c0_0 = arith.constant 0 : index
    %c0_1 = arith.constant 0 : index
    %c0_2 = arith.constant 0 : index
    %11 = vector.load %arg2[%c0_0, %c0_1, %c0_2] : memref<3x8x128xf32, #tpu.memory_space<vmem>>, vector<1x8x128xf32>
    %12 = vector.shape_cast %11 : vector<1x8x128xf32> to vector<8x128xf32>
    %c1_3 = arith.constant 1 : index
    %c0_4 = arith.constant 0 : index
    %c0_5 = arith.constant 0 : index
    %13 = vector.load %arg2[%c1_3, %c0_4, %c0_5] : memref<3x8x128xf32, #tpu.memory_space<vmem>>, vector<1x8x128xf32>
    %14 = vector.shape_cast %13 : vector<1x8x128xf32> to vector<8x128xf32>
    %c2_6 = arith.constant 2 : index
    %c0_7 = arith.constant 0 : index
    %c0_8 = arith.constant 0 : index
    %15 = vector.load %arg2[%c2_6, %c0_7, %c0_8] : memref<3x8x128xf32, #tpu.memory_space<vmem>>, vector<1x8x128xf32>
    %16 = vector.shape_cast %15 : vector<1x8x128xf32> to vector<8x128xf32>
    %17 = vector.broadcast %0 : f32 to vector<8x128xf32>
    %18 = arith.mulf %12, %17 : vector<8x128xf32>
    %19 = vector.broadcast %2 : f32 to vector<8x128xf32>
    %20 = arith.mulf %14, %19 : vector<8x128xf32>
    %21 = arith.addf %18, %20 : vector<8x128xf32>
    %22 = vector.broadcast %4 : f32 to vector<8x128xf32>
    %23 = arith.mulf %16, %22 : vector<8x128xf32>
    %24 = arith.addf %21, %23 : vector<8x128xf32>
    %25 = vector.broadcast %6 : f32 to vector<8x128xf32>
    %26 = arith.addf %24, %25 : vector<8x128xf32>
    %27 = vector.broadcast %1 : f32 to vector<8x128xf32>
    %28 = arith.mulf %12, %27 : vector<8x128xf32>
    %29 = vector.broadcast %3 : f32 to vector<8x128xf32>
    %30 = arith.mulf %14, %29 : vector<8x128xf32>
    %31 = arith.addf %28, %30 : vector<8x128xf32>
    %32 = vector.broadcast %5 : f32 to vector<8x128xf32>
    %33 = arith.mulf %16, %32 : vector<8x128xf32>
    %34 = arith.addf %31, %33 : vector<8x128xf32>
    %35 = vector.broadcast %7 : f32 to vector<8x128xf32>
    %36 = arith.addf %34, %35 : vector<8x128xf32>
    %cst = arith.constant 5.000000e-01 : f32
    %37 = vector.broadcast %cst : f32 to vector<8x128xf32>
    %38 = arith.mulf %37, %26 : vector<8x128xf32>
    %39 = math.tanh %38 : vector<8x128xf32>
    %cst_9 = arith.constant 1.000000e+00 : f32
    %40 = vector.broadcast %cst_9 : f32 to vector<8x128xf32>
    %41 = arith.addf %40, %39 : vector<8x128xf32>
    %cst_10 = arith.constant 5.000000e-01 : f32
    %42 = vector.broadcast %cst_10 : f32 to vector<8x128xf32>
    %43 = arith.mulf %42, %41 : vector<8x128xf32>
    %44 = arith.mulf %26, %43 : vector<8x128xf32>
    %cst_11 = arith.constant 5.000000e-01 : f32
    %45 = vector.broadcast %cst_11 : f32 to vector<8x128xf32>
    %46 = arith.mulf %45, %36 : vector<8x128xf32>
    %47 = math.tanh %46 : vector<8x128xf32>
    %cst_12 = arith.constant 1.000000e+00 : f32
    %48 = vector.broadcast %cst_12 : f32 to vector<8x128xf32>
    %49 = arith.addf %48, %47 : vector<8x128xf32>
    %cst_13 = arith.constant 5.000000e-01 : f32
    %50 = vector.broadcast %cst_13 : f32 to vector<8x128xf32>
    %51 = arith.mulf %50, %49 : vector<8x128xf32>
    %52 = arith.mulf %36, %51 : vector<8x128xf32>
    %53 = vector.broadcast %8 : f32 to vector<8x128xf32>
    %54 = arith.mulf %44, %53 : vector<8x128xf32>
    %55 = vector.broadcast %9 : f32 to vector<8x128xf32>
    %56 = arith.mulf %52, %55 : vector<8x128xf32>
    %57 = arith.addf %54, %56 : vector<8x128xf32>
    %58 = vector.broadcast %10 : f32 to vector<8x128xf32>
    %59 = arith.addf %57, %58 : vector<8x128xf32>
    %c0_14 = arith.constant 0 : index
    %c0_15 = arith.constant 0 : index
    %60 = vector.load %arg3[%c0_14, %c0_15] : memref<8x128xf32, #tpu.memory_space<vmem>>, vector<8x128xf32>
    tpu.vector_store %arg3[%c0_14, %c0_15], %59 {strides = array<i32>} : memref<8x128xf32, #tpu.memory_space<vmem>>, vector<8x128xf32>,
    return
  }
  func.func @transform_0(%arg0: i32) -> i32 {
    %c0_i32 = arith.constant 0 : i32
    %c0_i32_0 = arith.constant 0 : i32
    return %c0_i32 : i32
  }
  func.func @transform_1(%arg0: i32) -> (i32, i32, i32) {
    %c0_i32 = arith.constant 0 : i32
    %c0_i32_0 = arith.constant 0 : i32
    %c0_i32_1 = arith.constant 0 : i32
    return %c0_i32, %arg0, %c0_i32_0 : i32, i32, i32
  }
  func.func @transform_2(%arg0: i32) -> (i32, i32) {
    %c0_i32 = arith.constant 0 : i32
    %c0_i32_0 = arith.constant 0 : i32
    return %arg0, %c0_i32 : i32, i32
  }
}

</mosaic_0001>

<bundles_post_ra>
// kernel: tpu_custom_call.1
= control target key start
LH: loop header
LB: loop body
LE: loop exit
PB: predicated region body
PF: predicated region fallthrough
CT: control target
= control target key end

     0   :  { %7 = vsyncpa [#allocation5], 0  ;;  %s242_s0 = inlined_call_operand.hbm [shape: f32[11], index: 0, kind: input, shape index: {}]   ;;  %s243_s1 = inlined_call_operand.hbm [shape: f32[3,8,128], index: 1, kind: input, shape index: {}]   ;;  %s244_s2 = inlined_call_operand.hbm [shape: f32[8,128], index: 2, kind: output, shape index: {}]  }
   0x1   :  { %8 = vsyncpa [#allocation3], 0 }
   0x2   :  { %9 = vsyncpa [#allocation4], 0  ;;  %s126_s11 = scalar_lea.hbm %s242_s0, 16 }
   0x3   :  { %p127_p0 = scmp.ne.s32.totalorder %s242_s0, %s126_s11  ;;  %p130_p1 = scmp.lt.u32.totalorder %s126_s11, %s242_s0 }
   0x5   :  { %p132_p2 = pnand %p130_p1, %p127_p0 }
   0x7   :  { %135 = shalt.err (!%p132_p2)
}
   0x8   :  { %s186_s16 = smov [#allocation2]   ;;  %s187_s19 = smov [#allocation6]  }
   0x9   :  { %17 = dma.hbm_to_smem %s242_s0, 16, %s186_s16, [#allocation5]  }
   0xa   :  { %s23_s20 = sshll.u32 %s187_s19, 4  ;;  %s136_s23 = scalar_lea.hbm %s243_s1, 384  ;;  %s24_s20 = int_to_ptr.vmem [resolvable:$true] %s23_s20 }
   0xb   :  { %p137_p3 = scmp.ne.s32.totalorder %s243_s1, %s136_s23  ;;  %p140_p4 = scmp.lt.u32.totalorder %s136_s23, %s243_s1 }
   0xd   :  { %p142_p5 = pnand %p140_p4, %p137_p3 }
   0xf   :  { %145 = shalt.err (!%p142_p5)
}
  0x10   :  { %s146_s28 = scalar_lea.vmem %s24_s20, 384  ;;  %p151_p7 = scmp.lt.s32.totalorder %s24_s20, %s24_s20 }
  0x11   :  { %p147_p6 = scmp.ne.s32.totalorder %s24_s20, %s146_s28  ;;  %p152_p8 = scmp.lt.s32.totalorder %s146_s28, %s146_s28 }
  0x13   :  { %p153_p9 = por %p152_p8, %p151_p7 }
  0x15   :  { %p154_p10 = pnand %p153_p9, %p147_p6 }
  0x17   :  { %157 = shalt.err (!%p154_p10)
}
  0x18   :  { %s188_s0 = smov 128   ;;  %s189_s29 = smov 8  }
  0x19   :  { %29 = dma.hbm_to_vmem [thread:$0]  %s243_s1, 384, %s24_s20, [#allocation3], %s188_s0, %s188_s0, %s189_s29  }
  0x1a   :  { %180 = dma.done.wait [#allocation5], 16  }
  0x1b   :  { %181 = vsyncadd [#allocation5], 4294967280 }
  0x1c   :  { %182 = dma.done.wait [#allocation3], 384  }
  0x1d   :  { %183 = vsyncadd [#allocation3], 4294966912 }
  0x1e   :  { %36 = sfence }
  0x1f   :  { %s37_s4 = sld [smem:[#allocation2]]  ;;  %s107_s5 = sld [smem:[#allocation2 + $0x1]]  ;;  %v48_v0 = vld [vmem:[#allocation6] sm:$0xff]  ;;  %v50_v1 = vld [vmem:[#allocation6 + $0x8] sm:$0xff]  ;;  %v52_v2 = vld [vmem:[#allocation6 + $0x10] sm:$0xff] }
  0x20   :  { %s108_s6 = sld [smem:[#allocation2 + $0x2]]  ;;  %s109_s7 = sld [smem:[#allocation2 + $0x3]] }
  0x21   :  { %s110_s8 = sld [smem:[#allocation2 + $0x4]]  ;;  %s111_s9 = sld [smem:[#allocation2 + $0x5]] }
  0x22   :  { %s112_s10 = sld [smem:[#allocation2 + $0x6]]  ;;  %s113_s11 = sld [smem:[#allocation2 + $0x7]] }
  0x23   :  { %s114_s1 = sld [smem:[#allocation2 + $0x8]]  ;;  %s115_s12 = sld [smem:[#allocation2 + $0x9]] }
  0x24   :  { %s116_s13 = sld [smem:[#allocation2 + $0xa]]  ;;  %s190_s14 = smov [#allocation7]  }
  0x25   :  { %v53_v3 = vstv %s37_s4  ;;  %v63_v4 = vstv %s107_s5  ;;  %s97_s15 = sshll.u32 %s190_s14, 4  ;;  %s98_s15 = int_to_ptr.vmem [resolvable:$true] %s97_s15 }
  0x26   :  { %v54_v5 = vmul.f32 %v53_v3, %v48_v0  ;;  %v55_v6 = vstv %s108_s6  ;;  %v64_v7 = vmul.f32 %v63_v4, %v48_v0  ;;  %v65_v8 = vstv %s109_s7  ;;  %s158_s16 = scalar_lea.vmem %s98_s15, 128  ;;  %p163_p12 = scmp.lt.s32.totalorder %s98_s15, %s98_s15 }
  0x27   :  { %v56_v9 = vmul.f32 %v55_v6, %v50_v1  ;;  %v58_v10 = vstv %s110_s8  ;;  %v66_v11 = vmul.f32 %v65_v8, %v50_v1  ;;  %v68_v12 = vstv %s111_s9  ;;  %p159_p11 = scmp.ne.s32.totalorder %s98_s15, %s158_s16  ;;  %p164_p13 = scmp.lt.s32.totalorder %s158_s16, %s158_s16 }
  0x28   :  { %v59_v13 = vmul.f32 %v58_v10, %v52_v2  ;;  %v69_v14 = vmul.f32 %v68_v12, %v52_v2  ;;  %v61_v17 = vstv %s112_s10  ;;  %v71_v18 = vstv %s113_s11 }
  0x29   :  { %v57_v15 = vadd.f32 %v56_v9, %v54_v5  ;;  %v67_v16 = vadd.f32 %v66_v11, %v64_v7  ;;  %v83_v31 = vstv %s114_s1  ;;  %v85_v33 = vstv %s115_s12  ;;  %p165_p0 = por %p164_p13, %p163_p12 }
  0x2a   :  { %v88_v37 = vstv %s116_s13 }
  0x2b   :  { %v60_v19 = vadd.f32 %v59_v13, %v57_v15  ;;  %v70_v20 = vadd.f32 %v69_v14, %v67_v16  ;;  %p166_p1 = pnand %p165_p0, %p159_p11 }
  0x2d   :  { %v62_v21 = vadd.f32 %v61_v17, %v60_v19  ;;  %v72_v22 = vadd.f32 %v71_v18, %v70_v20 }
  0x2f   :  { %v73_v23 = vmul.f32 0.5, %v62_v21  ;;  %v78_v24 = vmul.f32 0.5, %v72_v22 }
  0x31   :  { %122 = vtanh.f32 %v73_v23 }
  0x32   :  { %124 = vtanh.f32 %v78_v24 }
  0x3b   :  { %v123_v25 = vpop.eup %122 }
  0x3c   :  { %v125_v26 = vpop.eup %124  ;;  %v75_v27 = vadd.f32 1.0, %v123_v25 }
  0x3d   :  { %v80_v28 = vadd.f32 1.0, %v125_v26 }
  0x3e   :  { %v76_v29 = vmul.f32 0.5, %v75_v27 }
  0x3f   :  { %v81_v30 = vmul.f32 0.5, %v80_v28 }
  0x40   :  { %v77_v32 = vmul.f32 %v76_v29, %v62_v21 }
  0x41   :  { %v82_v34 = vmul.f32 %v81_v30, %v72_v22 }
  0x42   :  { %v84_v35 = vmul.f32 %v83_v31, %v77_v32 }
  0x43   :  { %v86_v36 = vmul.f32 %v85_v33, %v82_v34 }
  0x45   :  { %v87_v38 = vadd.f32 %v86_v36, %v84_v35 }
  0x47   :  { %v89_v39 = vadd.f32 %v88_v37, %v87_v38 }
  0x49   :  { %90 = vst [vmem:[#allocation7] sm:$0xff] %v89_v39 }
  0x4a   :  { %169 = shalt.err (!%p166_p1)
}
  0x4b   :  { %s170_s19 = scalar_lea.hbm %s244_s2, 128 }
  0x4c   :  { %p171_p2 = scmp.ne.s32.totalorder %s244_s2, %s170_s19  ;;  %p174_p3 = scmp.lt.u32.totalorder %s170_s19, %s244_s2 }
  0x4e   :  { %p176_p4 = pnand %p174_p3, %p171_p2 }
  0x50   :  { %179 = shalt.err (!%p176_p4)
}
  0x51   :  { %100 = dma.vmem_to_hbm [thread:$0]  %s98_s15, 128, %s244_s2, [#allocation4]  }
  0x52   :  { %184 = dma.done.wait [#allocation4], 128  }
  0x53   :  { %185 = vsyncadd [#allocation4], 4294967168 }
  0x54   :  { %104 = vsyncpa [#allocation3], 1 }
  0x55   :  { %105 = vsyncpa [#allocation4], 1 }
  0x56   :  { %106 = vsyncpa [#allocation5], 1 }

</bundles_post_ra>
